<compile_context>
chip_gen: v6e
topology: v6e:2x2x1
jax: 0.10.0
libtpu: 0.0.40
codegen_flags: <defaults>
</compile_context>

<pallas_src>
import jax
import jax.numpy as jnp
from jax.experimental import pallas as pl
from jax.experimental.pallas import tpu as pltpu

INPUT_DIM = 2
H1 = 64
H2 = 32
OUT = 1

_HI = jax.lax.Precision.HIGHEST


def _mlp_kernel(x_ref, w1_ref, b1_ref, w2_ref, b2_ref, w3_ref, b3_ref, o_ref):
    """Fused 3-layer MLP on one batch tile, transposed (batch-on-lanes) layout.

    x_ref : (INPUT_DIM, TM)   features on sublanes, batch on lanes
    w1    : (H1, INPUT_DIM)   b1: (H1, 1)
    w2    : (H2, H1)          b2: (H2, 1)
    w3    : (OUT, H2)         b3: (OUT, 1)
    o_ref : (OUT, TM)         lane-dense output store
    """
    xt = x_ref[...]                                               # (INPUT_DIM, TM)

    # Layer 1: (H1, INPUT_DIM) @ (INPUT_DIM, TM) on the MXU (K=2 padding is free
    # -- the MXU was otherwise idle for this layer).
    h1 = jnp.dot(w1_ref[...], xt,
                 preferred_element_type=jnp.float32, precision=_HI)
    h1 = jnp.maximum(h1 + b1_ref[...], 0.0)                       # (H1, TM)

    # Layer 2: (H2, H1) @ (H1, TM) on the MXU.
    h2 = jnp.dot(w2_ref[...], h1,
                 preferred_element_type=jnp.float32, precision=_HI)
    h2 = jnp.maximum(h2 + b2_ref[...], 0.0)                       # (H2, TM)

    # Layer 3: (OUT, H2) @ (H2, TM) on the MXU.
    o = jnp.dot(w3_ref[...], h2,
                preferred_element_type=jnp.float32, precision=_HI)
    o_ref[...] = (o + b3_ref[...]).astype(o_ref.dtype)            # (OUT, TM)


def _round_up(n, m):
    return ((n + m - 1) // m) * m


def _default_tile_m(batch):
    """Adaptive batch tile (multiple of 128).

    - tiny batches: one 128-wide tile (minimize grid-step overhead);
    - mid-size batches: target ~2 tiles so both TCs on v7x get work;
    - large batches: cap the tile at 4096 lanes (~1.5 MiB of intermediates).
    On single-TC chips (v5e/v6e) this simply minimizes step count.
    """
    if batch <= 128:
        return 128
    two_tile = _round_up((batch + 1) // 2, 128)
    return min(two_tile, 4096)


def discriminator_forward(x, params, *, tile_m=None):
    """x: (B, INPUT_DIM) float32 -> (B, 1) float32."""
    w1, b1, w2, b2, w3, b3 = params
    B = x.shape[0]

    tm = _default_tile_m(B) if tile_m is None else tile_m
    assert tm % 128 == 0, "tile_m must be a multiple of 128 (lane width)"

    n_tiles = pl.cdiv(B, tm)
    b_pad = n_tiles * tm

    # Transpose to (features, batch); zero-pad batch to a tile multiple.
    # Padded columns produce well-defined (bias-only) values and are sliced off.
    xt = x.T
    if b_pad != B:
        xt = jnp.pad(xt, ((0, 0), (0, b_pad - B)))

    def const_spec(shape):
        # Small parameter fully resident; constant index_map => DMA'd once.
        return pl.BlockSpec(shape, lambda i: (0, 0))

    flops = 2 * b_pad * (INPUT_DIM * H1 + H1 * H2 + H2 * OUT)
    param_bytes = 4 * (H1 * INPUT_DIM + H1 + H2 * H1 + H2 + OUT * H2 + OUT)
    bytes_accessed = 4 * (INPUT_DIM * b_pad + OUT * b_pad) + param_bytes

    out_t = pl.pallas_call(
        _mlp_kernel,
        out_shape=jax.ShapeDtypeStruct((OUT, b_pad), jnp.float32),
        grid_spec=pltpu.PrefetchScalarGridSpec(
            num_scalar_prefetch=0,
            grid=(n_tiles,),
            in_specs=[
                pl.BlockSpec((INPUT_DIM, tm), lambda i: (0, i)),  # x^T tile
                const_spec((H1, INPUT_DIM)),                      # w1
                const_spec((H1, 1)),                              # b1
                const_spec((H2, H1)),                             # w2
                const_spec((H2, 1)),                              # b2
                const_spec((OUT, H2)),                            # w3 (nn.Linear layout)
                const_spec((OUT, 1)),                             # b3
            ],
            out_specs=pl.BlockSpec((OUT, tm), lambda i: (0, i)),
        ),
        compiler_params=pltpu.CompilerParams(
            dimension_semantics=("parallel",)),   # shards tiles across TCs (v7x)
        cost_estimate=pl.CostEstimate(
            flops=flops, transcendentals=0, bytes_accessed=bytes_accessed),
    )(xt, w1, b1, w2, b2, w3, b3)

    return out_t[:, :B].T                                          # (B, 1)


def init_params(key):
    """PyTorch-style init: uniform(-1/sqrt(fan_in), 1/sqrt(fan_in)).

    Weights stored (out_features, in_features) like nn.Linear; biases (out, 1).
    """
    ks = jax.random.split(key, 6)

    def lin(kw, kb, fan_in, fan_out):
        bound = 1.0 / jnp.sqrt(jnp.float32(fan_in))
        w = jax.random.uniform(kw, (fan_out, fan_in), jnp.float32, -bound, bound)
        b = jax.random.uniform(kb, (fan_out, 1), jnp.float32, -bound, bound)
        return w, b

    w1, b1 = lin(ks[0], ks[1], INPUT_DIM, H1)
    w2, b2 = lin(ks[2], ks[3], H1, H2)
    w3, b3 = lin(ks[4], ks[5], H2, OUT)
    return (w1, b1, w2, b2, w3, b3)


def reference_forward(x, params):
    """Plain JAX reference of the PyTorch forward pass (f32-exact matmuls)."""
    w1, b1, w2, b2, w3, b3 = params
    h1 = jnp.maximum(jnp.dot(x, w1.T, precision=_HI) + b1[:, 0], 0.0)
    h2 = jnp.maximum(jnp.dot(h1, w2.T, precision=_HI) + b2[:, 0], 0.0)
    return jnp.dot(h2, w3.T, precision=_HI) + b3[:, 0]


if __name__ == "__main__":
    key = jax.random.PRNGKey(0)
    k_param, k_x, k_x2 = jax.random.split(key, 3)

    params = init_params(k_param)

    # Small case: batch=8, input_dim=2 (single 128-wide tile, padded).
    x = jax.random.normal(k_x, (8, INPUT_DIM), jnp.float32)
    out = jax.block_until_ready(discriminator_forward(x, params))
    ref = reference_forward(x, params)
    assert out.shape == (8, 1)
    assert jnp.allclose(out, ref, atol=1e-4, rtol=1e-4), "mismatch vs reference (B=8)"

    # Multi-tile case: batch=300 -> 2 tiles of 256 lanes (exercises padding path).
    x2 = jax.random.normal(k_x2, (300, INPUT_DIM), jnp.float32)
    out2 = jax.block_until_ready(discriminator_forward(x2, params))
    ref2 = reference_forward(x2, params)
    assert out2.shape == (300, 1)
    assert jnp.allclose(out2, ref2, atol=1e-4, rtol=1e-4), "mismatch vs reference (B=300)"

    print("KERNEL_OK")
</pallas_src>

<mosaic_0001>
module attributes {stable_mosaic.version = 11 : i64} {
  func.func @_mlp_kernel(%arg0: i32, %arg1: memref<2x128xf32, #tpu.memory_space<vmem>>, %arg2: memref<64x2xf32, #tpu.memory_space<vmem>>, %arg3: memref<64x1xf32, #tpu.memory_space<vmem>>, %arg4: memref<32x64xf32, #tpu.memory_space<vmem>>, %arg5: memref<32x1xf32, #tpu.memory_space<vmem>>, %arg6: memref<1x32xf32, #tpu.memory_space<vmem>>, %arg7: memref<1x1xf32, #tpu.memory_space<vmem>>, %arg8: memref<1x128xf32, #tpu.memory_space<vmem>>) attributes {dimension_semantics = [#tpu.dimension_semantics<parallel>], iteration_bounds = array<i64: 1>, scalar_prefetch = 0 : i64, scratch_operands = 0 : i64, tpu.core_type = #tpu.core_type<tc>, window_params = [{transform_indices = @transform_0, window_bounds = array<i64: 2, 128>}, {pipeline_mode = #tpu.pipeline_mode<synchronous>, transform_indices = @transform_1, window_bounds = array<i64: 64, 2>}, {pipeline_mode = #tpu.pipeline_mode<synchronous>, transform_indices = @transform_2, window_bounds = array<i64: 64, 1>}, {pipeline_mode = #tpu.pipeline_mode<synchronous>, transform_indices = @transform_3, window_bounds = array<i64: 32, 64>}, {pipeline_mode = #tpu.pipeline_mode<synchronous>, transform_indices = @transform_4, window_bounds = array<i64: 32, 1>}, {pipeline_mode = #tpu.pipeline_mode<synchronous>, transform_indices = @transform_5, window_bounds = array<i64: 1, 32>}, {pipeline_mode = #tpu.pipeline_mode<synchronous>, transform_indices = @transform_6, window_bounds = array<i64: 1, 1>}, {transform_indices = @transform_7, window_bounds = array<i64: 1, 128>}]} {
    %c0 = arith.constant 0 : index
    %c0_0 = arith.constant 0 : index
    %0 = vector.load %arg1[%c0, %c0_0] : memref<2x128xf32, #tpu.memory_space<vmem>>, vector<2x128xf32>
    %c0_1 = arith.constant 0 : index
    %c0_2 = arith.constant 0 : index
    %1 = vector.load %arg2[%c0_1, %c0_2] : memref<64x2xf32, #tpu.memory_space<vmem>>, vector<64x2xf32>
    %cst = arith.constant dense<0.000000e+00> : vector<64x128xf32>
    %2 = tpu.matmul %1, %0, %cst {dimension_numbers = #tpu.dot_dimension_numbers<[1], [0], [0], [1], [0, 0, 1, 1], [], []>, precision = #tpu.contract_precision<fp32>} : vector<64x2xf32>, vector<2x128xf32>, vector<64x128xf32> -> vector<64x128xf32>
    %c0_3 = arith.constant 0 : index
    %c0_4 = arith.constant 0 : index
    %3 = vector.load %arg3[%c0_3, %c0_4] : memref<64x1xf32, #tpu.memory_space<vmem>>, vector<64x1xf32>
    %4 = vector.broadcast %3 : vector<64x1xf32> to vector<64x128xf32>
    %5 = arith.addf %2, %4 : vector<64x128xf32>
    %cst_5 = arith.constant 0.000000e+00 : f32
    %6 = vector.broadcast %cst_5 : f32 to vector<64x128xf32>
    %7 = arith.maximumf %5, %6 : vector<64x128xf32>
    %c0_6 = arith.constant 0 : index
    %c0_7 = arith.constant 0 : index
    %8 = vector.load %arg4[%c0_6, %c0_7] : memref<32x64xf32, #tpu.memory_space<vmem>>, vector<32x64xf32>
    %cst_8 = arith.constant dense<0.000000e+00> : vector<32x128xf32>
    %9 = tpu.matmul %8, %7, %cst_8 {dimension_numbers = #tpu.dot_dimension_numbers<[1], [0], [0], [1], [0, 0, 1, 1], [], []>, precision = #tpu.contract_precision<fp32>} : vector<32x64xf32>, vector<64x128xf32>, vector<32x128xf32> -> vector<32x128xf32>
    %c0_9 = arith.constant 0 : index
    %c0_10 = arith.constant 0 : index
    %10 = vector.load %arg5[%c0_9, %c0_10] : memref<32x1xf32, #tpu.memory_space<vmem>>, vector<32x1xf32>
    %11 = vector.broadcast %10 : vector<32x1xf32> to vector<32x128xf32>
    %12 = arith.addf %9, %11 : vector<32x128xf32>
    %cst_11 = arith.constant 0.000000e+00 : f32
    %13 = vector.broadcast %cst_11 : f32 to vector<32x128xf32>
    %14 = arith.maximumf %12, %13 : vector<32x128xf32>
    %c0_12 = arith.constant 0 : index
    %c0_13 = arith.constant 0 : index
    %15 = vector.load %arg6[%c0_12, %c0_13] : memref<1x32xf32, #tpu.memory_space<vmem>>, vector<1x32xf32>
    %cst_14 = arith.constant dense<0.000000e+00> : vector<1x128xf32>
    %16 = tpu.matmul %15, %14, %cst_14 {dimension_numbers = #tpu.dot_dimension_numbers<[1], [0], [0], [1], [0, 0, 1, 1], [], []>, precision = #tpu.contract_precision<fp32>} : vector<1x32xf32>, vector<32x128xf32>, vector<1x128xf32> -> vector<1x128xf32>
    %c0_15 = arith.constant 0 : index
    %c0_16 = arith.constant 0 : index
    %17 = vector.load %arg7[%c0_15, %c0_16] : memref<1x1xf32, #tpu.memory_space<vmem>>, vector<1x1xf32>
    %18 = vector.broadcast %17 : vector<1x1xf32> to vector<1x128xf32>
    %19 = arith.addf %16, %18 : vector<1x128xf32>
    %c0_17 = arith.constant 0 : index
    %c0_18 = arith.constant 0 : index
    %20 = vector.load %arg8[%c0_17, %c0_18] : memref<1x128xf32, #tpu.memory_space<vmem>>, vector<1x128xf32>
    tpu.vector_store %arg8[%c0_17, %c0_18], %19 {strides = array<i32>} : memref<1x128xf32, #tpu.memory_space<vmem>>, vector<1x128xf32>,
    return
  }
  func.func @transform_0(%arg0: i32) -> (i32, i32) {
    %c0_i32 = arith.constant 0 : i32
    %c0_i32_0 = arith.constant 0 : i32
    return %c0_i32, %arg0 : i32, i32
  }
  func.func @transform_1(%arg0: i32) -> (i32, i32) {
    %c0_i32 = arith.constant 0 : i32
    %c0_i32_0 = arith.constant 0 : i32
    %c0_i32_1 = arith.constant 0 : i32
    return %c0_i32, %c0_i32_0 : i32, i32
  }
  func.func @transform_2(%arg0: i32) -> (i32, i32) {
    %c0_i32 = arith.constant 0 : i32
    %c0_i32_0 = arith.constant 0 : i32
    %c0_i32_1 = arith.constant 0 : i32
    return %c0_i32, %c0_i32_0 : i32, i32
  }
  func.func @transform_3(%arg0: i32) -> (i32, i32) {
    %c0_i32 = arith.constant 0 : i32
    %c0_i32_0 = arith.constant 0 : i32
    %c0_i32_1 = arith.constant 0 : i32
    return %c0_i32, %c0_i32_0 : i32, i32
  }
  func.func @transform_4(%arg0: i32) -> (i32, i32) {
    %c0_i32 = arith.constant 0 : i32
    %c0_i32_0 = arith.constant 0 : i32
    %c0_i32_1 = arith.constant 0 : i32
    return %c0_i32, %c0_i32_0 : i32, i32
  }
  func.func @transform_5(%arg0: i32) -> (i32, i32) {
    %c0_i32 = arith.constant 0 : i32
    %c0_i32_0 = arith.constant 0 : i32
    %c0_i32_1 = arith.constant 0 : i32
    return %c0_i32, %c0_i32_0 : i32, i32
  }
  func.func @transform_6(%arg0: i32) -> (i32, i32) {
    %c0_i32 = arith.constant 0 : i32
    %c0_i32_0 = arith.constant 0 : i32
    %c0_i32_1 = arith.constant 0 : i32
    return %c0_i32, %c0_i32_0 : i32, i32
  }
  func.func @transform_7(%arg0: i32) -> (i32, i32) {
    %c0_i32 = arith.constant 0 : i32
    %c0_i32_0 = arith.constant 0 : i32
    return %c0_i32, %arg0 : i32, i32
  }
}

</mosaic_0001>

<bundles_post_ra>
// kernel: tpu_custom_call.1
= control target key start
LH: loop header
LB: loop body
LE: loop exit
PB: predicated region body
PF: predicated region fallthrough
CT: control target
= control target key end

     0   :  { %s3130_s0 = inlined_call_operand.vmem [shape: f32[2,128], index: 0, kind: input, shape index: {}]   ;;  %s3131_s1 = inlined_call_operand.vmem [shape: f32[64,2], index: 1, kind: input, shape index: {}]   ;;  %s3132_s2 = inlined_call_operand.vmem [shape: f32[64,1], index: 2, kind: input, shape index: {}]   ;;  %s3133_s3 = inlined_call_operand.vmem [shape: f32[32,64], index: 3, kind: input, shape index: {}]   ;;  %s3134_s4 = inlined_call_operand.vmem [shape: f32[32,1], index: 4, kind: input, shape index: {}]   ;;  %s3135_s5 = inlined_call_operand.vmem [shape: f32[1,32], index: 5, kind: input, shape index: {}]   ;;  %s3136_s6 = inlined_call_operand.<no memory space> [shape: f32[1,1], index: 6, kind: input, shape index: {}]   ;;  %s3137_s7 = inlined_call_operand.hbm [shape: f32[1,128], index: 7, kind: output, shape index: {}]  }
   0x1   :  { %v12_v0 = vstv %s3136_s6 }
   0x2   :  { %13 = vst [vmem:[#allocation2] sm:$0x1] %v12_v0 }
   0x3   :  { %v29_v1 = vld [vmem:[%s3130_s0] sm:$0x3]  ;;  %vm111_vm0 = vcmask 1041408   ;;  %vm86_vm1 = vcmask 15360   ;;  %v31_v3 = vld [vmem:[%s3131_s1 + $0x8] sm:$0xff]  ;;  %v32_v7 = vld [vmem:[%s3131_s1 + $0x10] sm:$0xff] }
   0x4   :  { %v30_v2 = vld [vmem:[%s3131_s1] sm:$0xff]  ;;  %v113_v4 = vsel %vm111_vm0, %v29_v1, 0  ;;  %v91_v6 = vsel %vm86_vm1, %v31_v3, 0  ;;  %v33_v8 = vld [vmem:[%s3131_s1 + $0x18] sm:$0xff]  ;;  %v94_v13 = vsel %vm86_vm1, %v32_v7, 0  ;;  %v35_v14 = vld [vmem:[%s3131_s1 + $0x28] sm:$0xff] }
   0x5   :  { %v88_v5 = vsel %vm86_vm1, %v30_v2, 0  ;;  %v34_v9 = vld [vmem:[%s3131_s1 + $0x20] sm:$0xff]  ;;  %v2629_v10 = vand.u32 4294901760, %v113_v4  ;;  %v2633_v12 = vand.u32 4294901760, %v91_v6  ;;  %v36_v15 = vld [vmem:[%s3131_s1 + $0x30] sm:$0xff]  ;;  %v2642_v16 = vand.u32 4294901760, %v94_v13 }
   0x6   :  { %v2631_v11 = vand.u32 4294901760, %v88_v5  ;;  %v97_v17 = vsel %vm86_vm1, %v33_v8, 0  ;;  %v100_v18 = vsel %vm86_vm1, %v34_v9, 0  ;;  %v103_v19 = vsel %vm86_vm1, %v35_v14, 0 }
   0x7   :  { %2252 = vmatprep.subr.mxu0 %v2629_v10  ;;  %v293_v21 = vsub.f32 %v113_v4, %v2629_v10  ;;  %v2653_v22 = vsub.f32 %v91_v6, %v2633_v12  ;;  %v2656_v23 = vand.u32 4294901760, %v97_v17  ;;  %v2660_v24 = vsub.f32 %v94_v13, %v2642_v16 }
   0x8   :  { %v2649_v20 = vsub.f32 %v88_v5, %v2631_v11  ;;  %2268 = vmatprep.mubr.f32.mxu1 %v2631_v11  ;;  %2253 = vmatpush3.msra.mxu0 %v2629_v10  ;;  %v2662_v25 = vand.u32 4294901760, %v100_v18  ;;  %v2664_v26 = vand.u32 4294901760, %v103_v19  ;;  %v106_v27 = vsel %vm86_vm1, %v36_v15, 0 }
   0x9   :  { %v2668_v29 = vand.u32 4294901760, %v293_v21  ;;  %2280 = vmatprep.subr.mxu0 %v293_v21  ;;  %v193_v30 = vand.u32 4294901760, %v2653_v22  ;;  %v2672_v31 = vsub.f32 %v97_v17, %v2656_v23  ;;  %v203_v32 = vand.u32 4294901760, %v2660_v24 }
   0xa   :  { %v183_v28 = vand.u32 4294901760, %v2649_v20  ;;  %v2676_v33 = vsub.f32 %v100_v18, %v2662_v25  ;;  %v2679_v34 = vsub.f32 %v103_v19, %v2664_v26  ;;  %v2681_v35 = vand.u32 4294901760, %v106_v27 }
   0xb   :  { %v295_v37 = vsub.f32 %v293_v21, %v2668_v29  ;;  %v194_v38 = vsub.f32 %v2653_v22, %v193_v30  ;;  %v213_v39 = vand.u32 4294901760, %v2672_v31 }
   0xc   :  { %v184_v36 = vsub.f32 %v2649_v20, %v183_v28 }
   0xd   :  { %14 = vsyncpa [#allocation4], 0  ;;  %v204_v40 = vsub.f32 %v2660_v24, %v203_v32  ;;  %v223_v41 = vand.u32 4294901760, %v2676_v33  ;;  %v233_v42 = vand.u32 4294901760, %v2679_v34  ;;  %v2697_v43 = vsub.f32 %v106_v27, %v2681_v35  ;;  %v37_v44 = vld [vmem:[%s3131_s1 + $0x38] sm:$0xff]  ;;  %v43_v1 = vld [vmem:[%s3132_s2 + $0x28] sm:$0xff] }
   0xe   :  { %v185_v45 = vand.u32 4294901760, %v184_v36  ;;  %v296_v46 = vand.u32 4294901760, %v295_v37  ;;  %v195_v47 = vand.u32 4294901760, %v194_v38  ;;  %v214_v48 = vsub.f32 %v2672_v31, %v213_v39  ;;  %v45_v62 = vld [vmem:[%s3132_s2 + $0x38] sm:$0xff]  ;;  %v44_v3 = vld [vmem:[%s3132_s2 + $0x30] sm:$0xff]  ;;  %v42_v4 = vld [vmem:[%s3132_s2 + $0x20] sm:$0xff] }
   0xf   :  { %v205_v49 = vand.u32 4294901760, %v204_v40  ;;  %v224_v50 = vsub.f32 %v2676_v33, %v223_v41  ;;  %v243_v51 = vand.u32 4294901760, %v2697_v43  ;;  %v109_v52 = vsel %vm86_vm1, %v37_v44, 0  ;;  %v41_v5 = vld [vmem:[%s3132_s2 + $0x18] sm:$0xff]  ;;  %v40_v6 = vld [vmem:[%s3132_s2 + $0x10] sm:$0xff]  ;;  %v39_v7 = vld [vmem:[%s3132_s2 + $0x8] sm:$0xff] }
  0x10   :  { %2254 = vmatprep.mubr.f32.mxu0 %v185_v45  ;;  %2266 = vmatprep.subr.mxu1 %v296_v46  ;;  %v215_v53 = vand.u32 4294901760, %v214_v48  ;;  %v234_v54 = vsub.f32 %v2679_v34, %v233_v42  ;;  %v2713_v55 = vand.u32 4294901760, %v109_v52  ;;  %v2562_v0 = vmov 0   ;;  %v38_v8 = vld [vmem:[%s3132_s2] sm:$0xff]  ;;  %v877_v9 = vld [vmem:[%s3134_s4 + $0x18] sm:$0xff]  ;;  %v875_v13 = vld [vmem:[%s3134_s4 + $0x8] sm:$0xff] }
  0x11   :  { %2255 = vmatmul.mubr.f32.vlgmr.msra.gmra.mxu0 %v195_v47  ;;  %2267 = vmatpush3.msra.mxu1 %v296_v46  ;;  %v225_v56 = vand.u32 4294901760, %v224_v50  ;;  %v244_v57 = vsub.f32 %v2697_v43, %v243_v51  ;;  %v874_v14 = vld [vmem:[%s3134_s4] sm:$0xff]  ;;  %vm898_vm2 = vcmask 523264   ;;  %vm2564_vm3 = vmmov 0  }
  0x12   :  { %2281 = vmatpush3.msra.mxu0 %v293_v21  ;;  %2269 = vmatmul.mubr.f32.vlgmr.msra.gmra.mxu1 %v2633_v12  ;;  %v2721_v58 = vsub.f32 %v109_v52, %v2713_v55  ;;  %v235_v59 = vand.u32 4294901760, %v234_v54  ;;  %v1582_v15 = vld [vmem:[#allocation2] sm:$0x1]  ;;  %vm1592_vm4 = vcmask 261120  }
  0x13   :  { %2294 = vmatprep.subr.mxu1 %v2629_v10  ;;  %2257 = vmatprep.mubr.f32.mxu0 %v205_v49  ;;  %v245_v61 = vand.u32 4294901760, %v244_v57 }
  0x14   :  { %2295 = vmatpush3.msra.mxu1 %v2629_v10  ;;  %2271 = vmatprep.mubr.f32.mxu1 %v2642_v16  ;;  %v253_v60 = vand.u32 4294901760, %v2721_v58 }
  0x15   :  { %2258 = vmatmul.mubr.f32.gmra.mxu0 %v215_v53  ;;  %2308 = vmatprep.subr.mxu0 %v2668_v29 }
  0x16   :  { %2272 = vmatmul.mubr.f32.gmra.mxu1 %v2656_v23  ;;  %2260 = vmatprep.mubr.f32.mxu0 %v225_v56  ;;  %v254_v63 = vsub.f32 %v2721_v58, %v253_v60 }
  0x17   :  { %2274 = vmatprep.mubr.f32.mxu1 %v2662_v25  ;;  %2322 = vmatprep.subr.mxu1 %v2629_v10 }
  0x18   :  { %2538 = vset.pattern.permute.xlu0 %v2562_v0  ;;  %2539 = vset.pattern.permute.xlu1 %v2562_v0  ;;  %v255_v2 = vand.u32 4294901760, %v254_v63 }
  0x19   :  { %2261 = vmatmul.mubr.f32.gmra.mxu0 %v235_v59  ;;  %83 = vperm.xlu0 %2538, %v45_v62  }
  0x1a   :  { %2275 = vmatmul.mubr.f32.gmra.mxu1 %v2664_v26  ;;  %2263 = vmatprep.mubr.f32.mxu0 %v245_v61 }
  0x1b   :  { %2277 = vmatprep.mubr.f32.mxu1 %v2681_v35  ;;  %73 = vperm.xlu1 %2539, %v43_v1  }
  0x1d   :  { %2264 = vmatmul.mubr.f32.gmra.mxu0 %v255_v2  ;;  %78 = vperm.xlu0 %2538, %v44_v3  }
  0x1e   :  { %2278 = vmatmul.mubr.f32.gmra.mxu1 %v2713_v55  ;;  %2282 = vmatprep.mubr.f32.mxu0 %v2649_v20 }
  0x1f   :  { %2296 = vmatprep.mubr.f32.mxu1 %v183_v28  ;;  %68 = vperm.xlu1 %2539, %v42_v4  }
  0x21   :  { %2283 = vmatmul.mubr.f32.vlgmr.msra.gmra.mxu0 %v2653_v22  ;;  %63 = vperm.xlu0 %2538, %v41_v5  }
  0x22   :  { %2309 = vmatpush3.msra.mxu0 %v2668_v29  ;;  %2297 = vmatmul.mubr.f32.vlgmr.msra.gmra.mxu1 %v193_v30 }
  0x23   :  { %2323 = vmatpush3.msra.mxu1 %v2629_v10  ;;  %2285 = vmatprep.mubr.f32.mxu0 %v2660_v24  ;;  %v876_v10 = vld [vmem:[%s3134_s4 + $0x10] sm:$0xff] }
  0x24   :  { %2299 = vmatprep.mubr.f32.mxu1 %v203_v32  ;;  %58 = vperm.xlu1 %2539, %v40_v6  }
  0x25   :  { %2286 = vmatmul.mubr.f32.gmra.mxu0 %v2672_v31  ;;  %53 = vperm.xlu0 %2538, %v39_v7  }
  0x26   :  { %2300 = vmatmul.mubr.f32.gmra.mxu1 %v213_v39  ;;  %2288 = vmatprep.mubr.f32.mxu0 %v2676_v33 }
  0x27   :  { %2302 = vmatprep.mubr.f32.mxu1 %v223_v41 }
  0x28   :  { %48 = vperm.xlu1 %2539, %v38_v8  }
  0x29   :  { %2289 = vmatmul.mubr.f32.gmra.mxu0 %v2679_v34  ;;  %895 = vperm.xlu0 %2538, %v877_v9  }
  0x2a   :  { %2303 = vmatmul.mubr.f32.gmra.mxu1 %v233_v42  ;;  %2291 = vmatprep.mubr.f32.mxu0 %v2697_v43 }
  0x2b   :  { %2305 = vmatprep.mubr.f32.mxu1 %v243_v51 }
  0x2c   :  { %890 = vperm.xlu1 %2539, %v876_v10  }
  0x2d   :  { %2292 = vmatmul.mubr.f32.gmra.mxu0 %v2721_v58  ;;  %885 = vperm.xlu0 %2538, %v875_v13  }
  0x2e   :  { %2306 = vmatmul.mubr.f32.gmra.mxu1 %v253_v60  ;;  %2310 = vmatprep.mubr.f32.mxu0 %v2631_v11 }
  0x2f   :  { %2324 = vmatprep.mubr.f32.mxu1 %v2631_v11  ;;  %v870_v11 = vld [vmem:[%s3133_s3] sm:$0xff] }
  0x30   :  { %880 = vperm.xlu1 %2539, %v874_v14  }
  0x31   :  { %2311 = vmatmul.mubr.f32.vlgmr.msra.gmra.mxu0 %v2633_v12  ;;  %1585 = vperm.xlu0 %2538, %v1582_v15  }
  0x32   :  { %2325 = vmatmul.mubr.f32.vlgmr.msra.gmra.mxu1 %v2633_v12  ;;  %2313 = vmatprep.mubr.f32.mxu0 %v2642_v16  ;;  %v900_v12 = vsel %vm898_vm2, %v870_v11, 0 }
  0x33   :  { %2327 = vmatprep.mubr.f32.mxu1 %v2642_v16  ;;  %v2814_v16 = vand.u32 4294901760, %v900_v12 }
  0x35   :  { %2314 = vmatmul.mubr.f32.gmra.mxu0 %v2656_v23  ;;  %v2817_v17 = vsub.f32 %v900_v12, %v2814_v16 }
  0x36   :  { %2328 = vmatmul.mubr.f32.gmra.mxu1 %v2656_v23  ;;  %2316 = vmatprep.mubr.f32.mxu0 %v2662_v25 }
  0x37   :  { %2330 = vmatprep.mubr.f32.mxu1 %v2662_v25  ;;  %v986_v18 = vand.u32 4294901760, %v2817_v17 }
  0x39   :  { %2317 = vmatmul.mubr.f32.gmra.mxu0 %v2664_v26  ;;  %v987_v19 = vsub.f32 %v2817_v17, %v986_v18 }
  0x3a   :  { %2331 = vmatmul.mubr.f32.gmra.mxu1 %v2664_v26  ;;  %2319 = vmatprep.mubr.f32.mxu0 %v2681_v35 }
  0x3b   :  { %2333 = vmatprep.mubr.f32.mxu1 %v2681_v35  ;;  %v988_v20 = vand.u32 4294901760, %v987_v19 }
  0x3d   :  { %2320 = vmatmul.mubr.f32.gmra.mxu0 %v2713_v55 }
  0x3e   :  { %2334 = vmatmul.mubr.f32.gmra.mxu1 %v2713_v55  ;;  %2352 = vmatprep.mubr.f32.mxu0 %v988_v20 }
  0x3f   :  { %2374 = vmatprep.mubr.f32.mxu1 %v2814_v16 }
  0x94   :  { %v84_v32 = vpop.permute.xlu0 %83 }
  0x96   :  { %v74_v35 = vpop.permute.xlu1 %73 }
  0x98   :  { %v79_v40 = vpop.permute.xlu0 %78 }
  0x9a   :  { %v69_v43 = vpop.permute.xlu1 %68 }
  0x9c   :  { %v64_v48 = vpop.permute.xlu0 %63 }
  0x9f   :  { %v59_v51 = vpop.permute.xlu1 %58 }
  0xa0   :  { %v54_v57 = vpop.permute.xlu0 %53 }
  0xa3   :  { %v49_v62 = vpop.permute.xlu1 %48 }
  0xd1   :  { %v2256_v21 = vpop.f32.mrf.mxu0 }
  0xd2   :  { %v2270_v22 = vpop.f32.mrf.mxu1  ;;  %v198_v2 = vadd.f32 %v2256_v21, %v54_v57 }
  0xd3   :  { %v187_v23 = vpop.f32.mrf.mxu0 }
  0xd4   :  { %v333_v24 = vpop.f32.mrf.mxu1  ;;  %v188_v8 = vadd.f32 %v187_v23, %v49_v62  ;;  %v340_v12 = vadd.f32 %v2270_v22, %v198_v2 }
  0xd5   :  { %v2259_v25 = vpop.f32.mrf.mxu0 }
  0xd6   :  { %v2273_v26 = vpop.f32.mrf.mxu1  ;;  %v218_v54 = vadd.f32 %v2259_v25, %v64_v48  ;;  %v334_v21 = vadd.f32 %v333_v24, %v188_v8 }
  0xd7   :  { %v207_v27 = vpop.f32.mrf.mxu0 }
  0xd8   :  { %v345_v28 = vpop.f32.mrf.mxu1  ;;  %v208_v58 = vadd.f32 %v207_v27, %v59_v51  ;;  %v352_v63 = vadd.f32 %v2273_v26, %v218_v54 }
  0xd9   :  { %v2262_v29 = vpop.f32.mrf.mxu0 }
  0xda   :  { %v2276_v30 = vpop.f32.mrf.mxu1  ;;  %v238_v60 = vadd.f32 %v2262_v29, %v74_v35  ;;  %v346_v4 = vadd.f32 %v345_v28, %v208_v58 }
  0xdb   :  { %v227_v31 = vpop.f32.mrf.mxu0 }
  0xdc   :  { %v357_v33 = vpop.f32.mrf.mxu1  ;;  %v228_v0 = vadd.f32 %v227_v31, %v69_v43  ;;  %v364_v9 = vadd.f32 %v2276_v30, %v238_v60 }
  0xdd   :  { %v2265_v34 = vpop.f32.mrf.mxu0 }
  0xde   :  { %v2279_v36 = vpop.f32.mrf.mxu1  ;;  %v258_v5 = vadd.f32 %v2265_v34, %v84_v32  ;;  %v358_v13 = vadd.f32 %v357_v33, %v228_v0 }
  0xdf   :  { %v247_v37 = vpop.f32.mrf.mxu0 }
  0xe0   :  { %v369_v38 = vpop.f32.mrf.mxu1  ;;  %v248_v14 = vadd.f32 %v247_v37, %v79_v40  ;;  %v376_v25 = vadd.f32 %v2279_v36, %v258_v5  ;;  %v871_v36 = vld [vmem:[%s3133_s3 + $0x8] sm:$0xff] }
  0xe1   :  { %v2284_v39 = vpop.f32.mrf.mxu0  ;;  %v903_v54 = vsel %vm898_vm2, %v871_v36, 0 }
  0xe2   :  { %v2298_v41 = vpop.f32.mrf.mxu1  ;;  %v457_v31 = vadd.f32 %v2284_v39, %v340_v12  ;;  %v370_v32 = vadd.f32 %v369_v38, %v248_v14 }
  0xe3   :  { %v449_v42 = vpop.f32.mrf.mxu0 }
  0xe4   :  { %v2824_v44 = vpop.f32.mrf.mxu1  ;;  %v450_v43 = vadd.f32 %v449_v42, %v334_v21 }
  0xe5   :  { %v2287_v45 = vpop.f32.mrf.mxu0 }
  0xe6   :  { %v2301_v46 = vpop.f32.mrf.mxu1  ;;  %v471_v6 = vadd.f32 %v2287_v45, %v352_v63  ;;  %v573_v51 = vadd.f32 %v2824_v44, %v450_v43 }
  0xe7   :  { %v463_v47 = vpop.f32.mrf.mxu0 }
  0xe8   :  { %v588_v49 = vpop.f32.mrf.mxu1  ;;  %v464_v15 = vadd.f32 %v463_v47, %v346_v4  ;;  %v597_v26 = vadd.f32 %v2301_v46, %v471_v6  ;;  %v581_v46 = vadd.f32 %v2298_v41, %v457_v31  ;;  %v872_v41 = vld [vmem:[%s3133_s3 + $0x10] sm:$0xff]  ;;  %v2839_v6 = vand.u32 4294901760, %v903_v54 }
  0xe9   :  { %v2290_v50 = vpop.f32.mrf.mxu0  ;;  %v906_v8 = vsel %vm898_vm2, %v872_v41, 0 }
  0xea   :  { %v2304_v52 = vpop.f32.mrf.mxu1  ;;  %v485_v19 = vadd.f32 %v2290_v50, %v364_v9  ;;  %v589_v34 = vadd.f32 %v588_v49, %v464_v15 }
  0xeb   :  { %v477_v53 = vpop.f32.mrf.mxu0 }
  0xec   :  { %v604_v55 = vpop.f32.mrf.mxu1  ;;  %v478_v27 = vadd.f32 %v477_v53, %v358_v13  ;;  %v613_v33 = vadd.f32 %v2304_v52, %v485_v19 }
  0xed   :  { %v2293_v56 = vpop.f32.mrf.mxu0 }
  0xee   :  { %v2307_v59 = vpop.f32.mrf.mxu1  ;;  %v499_v35 = vadd.f32 %v2293_v56, %v376_v25  ;;  %v605_v40 = vadd.f32 %v604_v55, %v478_v27  ;;  %v2853_v27 = vsub.f32 %v903_v54, %v2839_v6 }
  0xef   :  { %v491_v61 = vpop.f32.mrf.mxu0 }
  0xf0   :  { %v620_v1 = vpop.f32.mrf.mxu1  ;;  %v492_v45 = vadd.f32 %v491_v61, %v370_v32  ;;  %v629_v48 = vadd.f32 %v2307_v59, %v499_v35 }
  0xf1   :  { %v2312_v3 = vpop.f32.mrf.mxu0 }
  0xf2   :  { %v2326_v7 = vpop.f32.mrf.mxu1  ;;  %v709_v42 = vadd.f32 %v2312_v3, %v581_v46  ;;  %v621_v55 = vadd.f32 %v620_v1, %v492_v45  ;;  %v873_v1 = vld [vmem:[%s3133_s3 + $0x18] sm:$0xff] }
  0xf3   :  { %v702_v10 = vpop.f32.mrf.mxu0  ;;  %v909_v12 = vsel %vm898_vm2, %v873_v1, 0 }
  0xf4   :  { %v816_v11 = vpop.f32.mrf.mxu1  ;;  %v703_v59 = vadd.f32 %v702_v10, %v573_v51  ;;  %v823_v4 = vadd.f32 %v2326_v7, %v709_v42 }
  0xf5   :  { %v2315_v20 = vpop.f32.mrf.mxu0 }
  0xf6   :  { %v2329_v29 = vpop.f32.mrf.mxu1  ;;  %v721_v23 = vadd.f32 %v2315_v20, %v597_v26  ;;  %v817_v15 = vadd.f32 %v816_v11, %v703_v59  ;;  %v863_v26 = vmax.f32 %v823_v4, 0.0 }
  0xf7   :  { %v714_v28 = vpop.f32.mrf.mxu0 }
  0xf8   :  { %v828_v30 = vpop.f32.mrf.mxu1  ;;  %v715_v22 = vadd.f32 %v714_v28, %v589_v34  ;;  %v835_v38 = vadd.f32 %v2329_v29, %v721_v23  ;;  %v2855_v29 = vand.u32 4294901760, %v906_v8  ;;  %v862_v32 = vmax.f32 %v817_v15, 0.0 }
  0xf9   :  { %v2318_v37 = vpop.f32.mrf.mxu0  ;;  %v2869_v34 = vand.u32 4294901760, %v909_v12 }
  0xfa   :  { %v2332_v47 = vpop.f32.mrf.mxu1  ;;  %v733_v24 = vadd.f32 %v2318_v37, %v613_v33  ;;  %v829_v56 = vadd.f32 %v828_v30, %v715_v22  ;;  %v865_v63 = vmax.f32 %v835_v38, 0.0  ;;  %v2884_v33 = vand.u32 4294901760, %v863_v26 }
  0xfb   :  { %v726_v39 = vpop.f32.mrf.mxu0  ;;  %v996_v37 = vand.u32 4294901760, %v2853_v27  ;;  %v2903_v46 = vand.u32 4294901760, %v862_v32 }
  0xfc   :  { %v727_v49 = vadd.f32 %v726_v39, %v605_v40  ;;  %v840_v50 = vpop.f32.mrf.mxu1  ;;  %v847_v52 = vadd.f32 %v2332_v47, %v733_v24  ;;  %v864_v9 = vmax.f32 %v829_v56, 0.0  ;;  %v2845_v19 = vand.u32 4294901760, %v865_v63 }
  0xfd   :  { %v2321_v53 = vpop.f32.mrf.mxu0  ;;  %v2889_v40 = vsub.f32 %v906_v8, %v2855_v29  ;;  %v2907_v24 = vsub.f32 %v909_v12, %v2869_v34 }
  0xfe   :  { %v841_v57 = vadd.f32 %v840_v50, %v727_v49  ;;  %v745_v58 = vadd.f32 %v2321_v53, %v629_v48  ;;  %v2335_v60 = vpop.f32.mrf.mxu1  ;;  %v867_v61 = vmax.f32 %v847_v52, 0.0  ;;  %v2857_v21 = vand.u32 4294901760, %v864_v9 }
  0xff   :  { %v738_v62 = vpop.f32.mrf.mxu0  ;;  %v2872_v35 = vsub.f32 %v865_v63, %v2845_v19  ;;  %v2918_v50 = vsub.f32 %v863_v26, %v2884_v33  ;;  %v1006_v51 = vand.u32 4294901760, %v2889_v40  ;;  %v997_v53 = vsub.f32 %v2853_v27, %v996_v37  ;;  %v891_v26 = vpop.permute.xlu1 %890 }
 0x100   :  { %v866_v0 = vmax.f32 %v841_v57, 0.0  ;;  %v859_v44 = vadd.f32 %v2335_v60, %v745_v58  ;;  %v739_v2 = vadd.f32 %v738_v62, %v621_v55  ;;  %v852_v3 = vpop.f32.mrf.mxu1  ;;  %v2837_v5 = vand.u32 4294901760, %v867_v61 }
 0x101   :  { %v2892_v45 = vsub.f32 %v864_v9, %v2857_v21  ;;  %v2915_v49 = vand.u32 4294901760, %v2872_v35  ;;  %v2932_v55 = vsub.f32 %v862_v32, %v2903_v46  ;;  %v1016_v56 = vand.u32 4294901760, %v2907_v24 }
 0x102   :  { %v2842_v10 = vand.u32 4294901760, %v866_v0  ;;  %v869_v13 = vmax.f32 %v859_v44, 0.0  ;;  %v853_v14 = vadd.f32 %v852_v3, %v739_v2  ;;  %v2848_v20 = vsub.f32 %v867_v61, %v2837_v5 }
 0x103   :  { %v2929_v54 = vand.u32 4294901760, %v2892_v45  ;;  %v1072_v58 = vsub.f32 %v2872_v35, %v2915_v49  ;;  %v1007_v60 = vsub.f32 %v2889_v40, %v1006_v51  ;;  %v2944_v41 = vand.u32 4294901760, %v2918_v50  ;;  %v881_v32 = vpop.permute.xlu1 %880 }
 0x104   :  { %v2850_v7 = vand.u32 4294901760, %v869_v13  ;;  %v868_v25 = vmax.f32 %v853_v14, 0.0  ;;  %v2860_v11 = vsub.f32 %v866_v0, %v2842_v10  ;;  %v2882_v43 = vand.u32 4294901760, %v2848_v20 }
 0x105   :  { %v998_v61 = vand.u32 4294901760, %v997_v53  ;;  %v1079_v62 = vsub.f32 %v2892_v45, %v2929_v54  ;;  %v1017_v63 = vsub.f32 %v2907_v24, %v1016_v56  ;;  %v2954_v0 = vand.u32 4294901760, %v2932_v55 }
 0x106   :  { %v2863_v31 = vsub.f32 %v869_v13, %v2850_v7  ;;  %v2865_v28 = vand.u32 4294901760, %v868_v25  ;;  %2336 = vmatprep.subr.mxu0 %v2850_v7  ;;  %v2901_v36 = vand.u32 4294901760, %v2860_v11  ;;  %v1058_v38 = vsub.f32 %v2848_v20, %v2882_v43 }
 0x107   :  { %2337 = vmatpush3.msra.mxu0 %v2850_v7  ;;  %v1073_v44 = vand.u32 4294901760, %v1072_v58  ;;  %v1008_v2 = vand.u32 4294901760, %v1007_v60  ;;  %v1086_v3 = vsub.f32 %v2918_v50, %v2944_v41  ;;  %v1080_v1 = vand.u32 4294901760, %v1079_v62 }
 0x108   :  { %v2875_v23 = vsub.f32 %v868_v25, %v2865_v28  ;;  %2338 = vmatprep.subr.mxu0 %v2865_v28  ;;  %v2879_v30 = vand.u32 4294901760, %v2863_v31  ;;  %v1065_v52 = vsub.f32 %v2860_v11, %v2901_v36  ;;  %v1059_v57 = vand.u32 4294901760, %v1058_v38 }
 0x109   :  { %2339 = vmatpush3.msra.mxu0 %v2865_v28  ;;  %v1018_v4 = vand.u32 4294901760, %v1017_v63  ;;  %v1093_v8 = vsub.f32 %v2932_v55, %v2954_v0  ;;  %v1087_v9 = vand.u32 4294901760, %v1086_v3 }
 0x10a   :  { %2340 = vmatprep.subr.mxu0 %v2837_v5  ;;  %v1044_v22 = vsub.f32 %v2863_v31, %v2879_v30  ;;  %v2898_v47 = vand.u32 4294901760, %v2875_v23  ;;  %v1066_v59 = vand.u32 4294901760, %v1065_v52 }
 0x10b   :  { %2341 = vmatpush3.msra.mxu0 %v2837_v5  ;;  %v1094_v13 = vand.u32 4294901760, %v1093_v8 }
 0x10c   :  { %2342 = vmatprep.subr.mxu0 %v2842_v10  ;;  %v1045_v39 = vand.u32 4294901760, %v1044_v22  ;;  %v1051_v48 = vsub.f32 %v2875_v23, %v2898_v47 }
 0x10d   :  { %2343 = vmatpush3.msra.mxu0 %v2842_v10 }
 0x10e   :  { %2344 = vmatprep.subr.mxu0 %v2845_v19  ;;  %2358 = vmatprep.subr.mxu1 %v1045_v39  ;;  %v1052_v42 = vand.u32 4294901760, %v1051_v48 }
 0x10f   :  { %2345 = vmatpush3.msra.mxu0 %v2845_v19  ;;  %2359 = vmatpush3.msra.mxu1 %v1045_v39 }
 0x110   :  { %2346 = vmatprep.subr.mxu0 %v2857_v21  ;;  %2360 = vmatprep.subr.mxu1 %v1052_v42 }
 0x111   :  { %2347 = vmatpush3.msra.mxu0 %v2857_v21  ;;  %2361 = vmatpush3.msra.mxu1 %v1052_v42 }
 0x112   :  { %2348 = vmatprep.subr.mxu0 %v2884_v33  ;;  %2362 = vmatprep.subr.mxu1 %v1059_v57 }
 0x113   :  { %2349 = vmatpush3.msra.mxu0 %v2884_v33  ;;  %2363 = vmatpush3.msra.mxu1 %v1059_v57 }
 0x114   :  { %2350 = vmatprep.subr.mxu0 %v2903_v46  ;;  %2364 = vmatprep.subr.mxu1 %v1066_v59 }
 0x115   :  { %2351 = vmatpush3.msra.mxu0 %v2903_v46  ;;  %2365 = vmatpush3.msra.mxu1 %v1066_v59 }
 0x116   :  { %2353 = vmatmul.mubr.f32.vlgmr.msra.gmra.mxu0 %v998_v61  ;;  %2366 = vmatprep.subr.mxu1 %v1073_v44 }
 0x117   :  { %2380 = vmatprep.subr.mxu0 %v2863_v31  ;;  %2367 = vmatpush3.msra.mxu1 %v1073_v44 }
 0x118   :  { %2381 = vmatpush3.msra.mxu0 %v2863_v31  ;;  %2368 = vmatprep.subr.mxu1 %v1080_v1 }
 0x119   :  { %2382 = vmatprep.subr.mxu0 %v2875_v23  ;;  %2355 = vmatprep.mubr.f32.mxu0 %v1008_v2 }
 0x11a   :  { %2369 = vmatpush3.msra.mxu1 %v1080_v1  ;;  %2383 = vmatpush3.msra.mxu0 %v2875_v23 }
 0x11b   :  { %2356 = vmatmul.mubr.f32.gmra.mxu0 %v1018_v4  ;;  %2370 = vmatprep.subr.mxu1 %v1087_v9 }
 0x11c   :  { %2384 = vmatprep.subr.mxu0 %v2848_v20  ;;  %2371 = vmatpush3.msra.mxu1 %v1087_v9 }
 0x11d   :  { %2385 = vmatpush3.msra.mxu0 %v2848_v20  ;;  %2372 = vmatprep.subr.mxu1 %v1094_v13  ;;  %v896_v20 = vpop.permute.xlu0 %895 }
 0x11e   :  { %2386 = vmatprep.subr.mxu0 %v2860_v11  ;;  %2373 = vmatpush3.msra.mxu1 %v1094_v13 }
 0x11f   :  { %2387 = vmatpush3.msra.mxu0 %v2860_v11  ;;  %2375 = vmatmul.mubr.f32.vlgmr.msra.gmra.mxu1 %v2839_v6 }
 0x120   :  { %2388 = vmatprep.subr.mxu0 %v2872_v35  ;;  %2402 = vmatprep.subr.mxu1 %v2850_v7 }
 0x121   :  { %2389 = vmatpush3.msra.mxu0 %v2872_v35  ;;  %2403 = vmatpush3.msra.mxu1 %v2850_v7 }
 0x122   :  { %2390 = vmatprep.subr.mxu0 %v2892_v45  ;;  %2404 = vmatprep.subr.mxu1 %v2865_v28 }
 0x123   :  { %2377 = vmatprep.mubr.f32.mxu1 %v2855_v29  ;;  %2391 = vmatpush3.msra.mxu0 %v2892_v45 }
 0x124   :  { %2405 = vmatpush3.msra.mxu1 %v2865_v28  ;;  %2392 = vmatprep.subr.mxu0 %v2918_v50 }
 0x125   :  { %2378 = vmatmul.mubr.f32.gmra.mxu1 %v2869_v34  ;;  %2406 = vmatprep.subr.mxu1 %v2837_v5 }
 0x126   :  { %2393 = vmatpush3.msra.mxu0 %v2918_v50  ;;  %2407 = vmatpush3.msra.mxu1 %v2837_v5 }
 0x127   :  { %2394 = vmatprep.subr.mxu0 %v2932_v55  ;;  %2408 = vmatprep.subr.mxu1 %v2842_v10 }
 0x128   :  { %2395 = vmatpush3.msra.mxu0 %v2932_v55  ;;  %2396 = vmatprep.mubr.f32.mxu0 %v2817_v17 }
 0x129   :  { %2409 = vmatpush3.msra.mxu1 %v2842_v10  ;;  %2397 = vmatmul.mubr.f32.vlgmr.msra.gmra.mxu0 %v2853_v27 }
 0x12a   :  { %2410 = vmatprep.subr.mxu1 %v2845_v19  ;;  %2424 = vmatprep.subr.mxu0 %v2879_v30 }
 0x12b   :  { %2411 = vmatpush3.msra.mxu1 %v2845_v19  ;;  %2425 = vmatpush3.msra.mxu0 %v2879_v30 }
 0x12c   :  { %2412 = vmatprep.subr.mxu1 %v2857_v21  ;;  %2426 = vmatprep.subr.mxu0 %v2898_v47 }
 0x12d   :  { %2399 = vmatprep.mubr.f32.mxu0 %v2889_v40  ;;  %2413 = vmatpush3.msra.mxu1 %v2857_v21 }
 0x12e   :  { %2427 = vmatpush3.msra.mxu0 %v2898_v47  ;;  %2414 = vmatprep.subr.mxu1 %v2884_v33 }
 0x12f   :  { %2400 = vmatmul.mubr.f32.gmra.mxu0 %v2907_v24  ;;  %2428 = vmatprep.subr.mxu0 %v2882_v43 }
 0x130   :  { %2415 = vmatpush3.msra.mxu1 %v2884_v33  ;;  %2429 = vmatpush3.msra.mxu0 %v2882_v43 }
 0x131   :  { %2416 = vmatprep.subr.mxu1 %v2903_v46  ;;  %2430 = vmatprep.subr.mxu0 %v2901_v36 }
 0x132   :  { %2417 = vmatpush3.msra.mxu1 %v2903_v46  ;;  %2418 = vmatprep.mubr.f32.mxu1 %v986_v18 }
 0x133   :  { %2431 = vmatpush3.msra.mxu0 %v2901_v36  ;;  %2419 = vmatmul.mubr.f32.vlgmr.msra.gmra.mxu1 %v996_v37 }
 0x134   :  { %2432 = vmatprep.subr.mxu0 %v2915_v49  ;;  %2446 = vmatprep.subr.mxu1 %v2850_v7 }
 0x135   :  { %2433 = vmatpush3.msra.mxu0 %v2915_v49  ;;  %2447 = vmatpush3.msra.mxu1 %v2850_v7 }
 0x136   :  { %2434 = vmatprep.subr.mxu0 %v2929_v54  ;;  %2448 = vmatprep.subr.mxu1 %v2865_v28 }
 0x137   :  { %2421 = vmatprep.mubr.f32.mxu1 %v1006_v51  ;;  %2435 = vmatpush3.msra.mxu0 %v2929_v54 }
 0x138   :  { %2449 = vmatpush3.msra.mxu1 %v2865_v28  ;;  %2436 = vmatprep.subr.mxu0 %v2944_v41 }
 0x139   :  { %2422 = vmatmul.mubr.f32.gmra.mxu1 %v1016_v56  ;;  %2450 = vmatprep.subr.mxu1 %v2837_v5 }
 0x13a   :  { %2437 = vmatpush3.msra.mxu0 %v2944_v41  ;;  %2451 = vmatpush3.msra.mxu1 %v2837_v5 }
 0x13b   :  { %2438 = vmatprep.subr.mxu0 %v2954_v0  ;;  %2452 = vmatprep.subr.mxu1 %v2842_v10 }
 0x13c   :  { %2439 = vmatpush3.msra.mxu0 %v2954_v0  ;;  %2440 = vmatprep.mubr.f32.mxu0 %v2814_v16 }
 0x13d   :  { %2453 = vmatpush3.msra.mxu1 %v2842_v10  ;;  %2441 = vmatmul.mubr.f32.vlgmr.msra.gmra.mxu0 %v2839_v6 }
 0x13e   :  { %2454 = vmatprep.subr.mxu1 %v2845_v19  ;;  %2443 = vmatprep.mubr.f32.mxu0 %v2855_v29 }
 0x13f   :  { %2455 = vmatpush3.msra.mxu1 %v2845_v19  ;;  %2462 = vmatprep.mubr.f32.mxu1 %v2814_v16  ;;  %v2563_v16 = vmov 0.0  }
 0x140   :  { %2456 = vmatprep.subr.mxu1 %v2857_v21  ;;  %2468 = vmatprep.subr.mxu0 %v2563_v16 }
 0x141   :  { %2457 = vmatpush3.msra.mxu1 %v2857_v21  ;;  %2444 = vmatmul.mubr.f32.gmra.mxu0 %v2869_v34  ;;  %v886_v21 = vpop.permute.xlu0 %885 }
 0x142   :  { %2458 = vmatprep.subr.mxu1 %v2884_v33  ;;  %2476 = vmatprep.mubr.msk.f32.mxu0 %vm2564_vm3, %v2563_v16 }
 0x143   :  { %2459 = vmatpush3.msra.mxu1 %v2884_v33 }
 0x144   :  { %2460 = vmatprep.subr.mxu1 %v2903_v46 }
 0x145   :  { %2461 = vmatpush3.msra.mxu1 %v2903_v46 }
 0x146   :  { %2463 = vmatmul.mubr.f32.vlgmr.msra.gmra.mxu1 %v2839_v6  ;;  %2479 = vmatprep.subr.mxu1 %v2563_v16 }
 0x147   :  { %2465 = vmatprep.mubr.f32.mxu1 %v2855_v29 }
 0x14a   :  { %2466 = vmatmul.mubr.f32.gmra.mxu1 %v2869_v34  ;;  %v1581_v34 = vld [vmem:[%s3135_s5] sm:$0x1]  ;;  %s2565_s5 = smov [#allocation3]  }
 0x14b   :  { %2487 = vmatprep.mubr.msk.f32.mxu1 %vm2564_vm3, %v2563_v16  ;;  %v1594_v45 = vsel %vm1592_vm4, %v1581_v34, 0  ;;  %v1588_v34 = vlaneseq  ;;  %s2088_s23 = sshll.u32 %s2565_s5, 4  ;;  %s2089_s23 = int_to_ptr.vmem [resolvable:$true] %s2088_s23 }
 0x14c   :  { %v3058_v48 = vand.u32 4294901760, %v1594_v45  ;;  %s2540_s24 = scalar_lea.vmem %s2089_s23, 16  ;;  %s2544_s25 = scalar_lea.vmem %s2089_s23, 32 }
 0x14d   :  { %p2541_p0 = scmp.ne.s32.totalorder %s2089_s23, %s2540_s24  ;;  %p2545_p1 = scmp.lt.s32.totalorder %s2089_s23, %s2089_s23 }
 0x14e   :  { %v3061_v58 = vsub.f32 %v1594_v45, %v3058_v48  ;;  %p2546_p2 = scmp.lt.s32.totalorder %s2544_s25, %s2540_s24 }
 0x150   :  { %v1667_v1 = vand.u32 4294901760, %v3061_v58  ;;  %p2547_p3 = por %p2546_p2, %p2545_p1 }
 0x152   :  { %p2548_p4 = pnand %p2547_p3, %p2541_p0 }
 0x1d6   :  { %v2354_v17 = vpop.f32.mrf.mxu0 }
 0x1d7   :  { %v1001_v31 = vadd.f32 %v2354_v17, %v886_v21 }
 0x1d8   :  { %v990_v18 = vpop.f32.mrf.mxu0 }
 0x1d9   :  { %v991_v35 = vadd.f32 %v990_v18, %v881_v32 }
 0x1db   :  { %v2357_v5 = vpop.f32.mrf.mxu0 }
 0x1dc   :  { %v1021_v33 = vadd.f32 %v2357_v5, %v896_v20  ;;  %v1668_v5 = vsub.f32 %v3061_v58, %v1667_v1 }
 0x1dd   :  { %v1010_v10 = vpop.f32.mrf.mxu0 }
 0x1de   :  { %v1011_v22 = vadd.f32 %v1010_v10, %v891_v26  ;;  %v1669_v20 = vand.u32 4294901760, %v1668_v5 }
 0x1df   :  { %v2376_v6 = vpop.f32.mrf.mxu1 }
 0x1e0   :  { %v1138_v23 = vadd.f32 %v2376_v6, %v1001_v31 }
 0x1e1   :  { %v1131_v14 = vpop.f32.mrf.mxu1 }
 0x1e2   :  { %v1132_v37 = vadd.f32 %v1131_v14, %v991_v35 }
 0x1e5   :  { %v2379_v12 = vpop.f32.mrf.mxu1 }
 0x1e6   :  { %v1150_v47 = vadd.f32 %v2379_v12, %v1021_v33  ;;  %v1586_v33 = vpop.permute.xlu0 %1585 }
 0x1e7   :  { %v1143_v7 = vpop.f32.mrf.mxu1 }
 0x1e8   :  { %v1144_v38 = vadd.f32 %v1143_v7, %v1011_v22 }
 0x1e9   :  { %v2398_v15 = vpop.f32.mrf.mxu0 }
 0x1ea   :  { %v1245_v40 = vadd.f32 %v2398_v15, %v1138_v23 }
 0x1eb   :  { %v1237_v19 = vpop.f32.mrf.mxu0 }
 0x1ec   :  { %v1238_v36 = vadd.f32 %v1237_v19, %v1132_v37 }
 0x1ef   :  { %v2401_v25 = vpop.f32.mrf.mxu0 }
 0x1f0   :  { %v1259_v49 = vadd.f32 %v2401_v25, %v1150_v47 }
 0x1f1   :  { %v1251_v29 = vpop.f32.mrf.mxu0 }
 0x1f2   :  { %v1252_v52 = vadd.f32 %v1251_v29, %v1144_v38 }
 0x1f3   :  { %v2420_v27 = vpop.f32.mrf.mxu1 }
 0x1f4   :  { %v1348_v46 = vadd.f32 %v2420_v27, %v1245_v40 }
 0x1f5   :  { %v1339_v11 = vpop.f32.mrf.mxu1 }
 0x1f6   :  { %v1340_v50 = vadd.f32 %v1339_v11, %v1238_v36 }
 0x1f9   :  { %v2423_v30 = vpop.f32.mrf.mxu1 }
 0x1fa   :  { %v1364_v53 = vadd.f32 %v2423_v30, %v1259_v49  ;;  %v1589_v30 = vshrl.u32 %v1588_v34, 7 }
 0x1fb   :  { %v1355_v24 = vpop.f32.mrf.mxu1 }
 0x1fc   :  { %v1356_v60 = vadd.f32 %v1355_v24, %v1252_v52 }
 0x1fd   :  { %v2442_v28 = vpop.f32.mrf.mxu0 }
 0x1fe   :  { %v1465_v51 = vadd.f32 %v2442_v28, %v1348_v46 }
 0x1ff   :  { %v1458_v43 = vpop.f32.mrf.mxu0 }
 0x200   :  { %v1459_v54 = vadd.f32 %v1458_v43, %v1340_v50  ;;  %v1590_v43 = vsub.s32 0, %v1589_v30 }
 0x201   :  { %v2445_v39 = vpop.f32.mrf.mxu0 }
 0x202   :  { %v1477_v41 = vadd.f32 %v2445_v39, %v1364_v53  ;;  %v1591_v22 = vrot.slane %v1586_v33, %v1590_v43 }
 0x203   :  { %v1470_v56 = vpop.f32.mrf.mxu0 }
 0x204   :  { %v1471_v63 = vadd.f32 %v1470_v56, %v1356_v60 }
 0x206   :  { %v2464_v42 = vpop.f32.mrf.mxu1 }
 0x207   :  { %v1562_v55 = vadd.f32 %v2464_v42, %v1465_v51 }
 0x208   :  { %v1555_v57 = vpop.f32.mrf.mxu1 }
 0x209   :  { %v1578_v59 = vmax.f32 %v1562_v55, 0.0  ;;  %v1556_v61 = vadd.f32 %v1555_v57, %v1459_v54 }
 0x20a   :  { %v2467_v62 = vpop.f32.mrf.mxu1 }
 0x20b   :  { %v3063_v0 = vand.u32 4294901760, %v1578_v59  ;;  %v1577_v44 = vmax.f32 %v1556_v61, 0.0  ;;  %v1574_v2 = vadd.f32 %v2467_v62, %v1477_v41 }
 0x20c   :  { %v1567_v3 = vpop.f32.mrf.mxu1 }
 0x20d   :  { %v3066_v4 = vand.u32 4294901760, %v1577_v44  ;;  %v1580_v8 = vmax.f32 %v1574_v2, 0.0  ;;  %v1568_v9 = vadd.f32 %v1567_v3, %v1471_v63  ;;  %v1715_v13 = vsub.f32 %v1578_v59, %v3063_v0 }
 0x20f   :  { %v3069_v17 = vand.u32 4294901760, %v1580_v8  ;;  %v1579_v18 = vmax.f32 %v1568_v9, 0.0  ;;  %v1722_v6 = vsub.f32 %v1577_v44, %v3066_v4  ;;  %v1716_v15 = vand.u32 4294901760, %v1715_v13 }
 0x211   :  { %v1701_v10 = vsub.f32 %v1580_v8, %v3069_v17  ;;  %v3076_v14 = vand.u32 4294901760, %v1579_v18  ;;  %2469 = vmatpush3.msra.mxu0 %v3069_v17  ;;  %v1723_v7 = vand.u32 4294901760, %v1722_v6  ;;  %v1717_v27 = vsub.f32 %v1715_v13, %v1716_v15 }
 0x212   :  { %2470 = vmatprep.subr.mxu0 %v2563_v16 }
 0x213   :  { %v1702_v12 = vand.u32 4294901760, %v1701_v10  ;;  %v1708_v19 = vsub.f32 %v1579_v18, %v3076_v14  ;;  %2471 = vmatpush3.msra.mxu0 %v3076_v14  ;;  %v1724_v11 = vsub.f32 %v1722_v6, %v1723_v7  ;;  %v1718_v28 = vand.u32 4294901760, %v1717_v27 }
 0x214   :  { %2472 = vmatprep.subr.mxu0 %v2563_v16 }
 0x215   :  { %v1703_v25 = vsub.f32 %v1701_v10, %v1702_v12  ;;  %v1709_v26 = vand.u32 4294901760, %v1708_v19  ;;  %2473 = vmatpush3.msra.mxu0 %v3063_v0  ;;  %v1725_v32 = vand.u32 4294901760, %v1724_v11 }
 0x216   :  { %2474 = vmatprep.subr.mxu0 %v2563_v16 }
 0x217   :  { %v1710_v29 = vsub.f32 %v1708_v19, %v1709_v26  ;;  %2475 = vmatpush3.msra.mxu0 %v3066_v4  ;;  %v1704_v21 = vand.u32 4294901760, %v1703_v25 }
 0x218   :  { %2477 = vmatmul.mubr.f32.vlgmr.msra.gmra.mxu0 %v1669_v20  ;;  %2490 = vmatprep.subr.mxu0 %v2563_v16 }
 0x219   :  { %2480 = vmatpush3.msra.mxu1 %v1704_v21  ;;  %2491 = vmatpush3.msra.mxu0 %v1701_v10  ;;  %v1711_v31 = vand.u32 4294901760, %v1710_v29 }
 0x21a   :  { %2481 = vmatprep.subr.mxu1 %v2563_v16  ;;  %2492 = vmatprep.subr.mxu0 %v2563_v16 }
 0x21b   :  { %2482 = vmatpush3.msra.mxu1 %v1711_v31  ;;  %2493 = vmatpush3.msra.mxu0 %v1708_v19 }
 0x21c   :  { %2483 = vmatprep.subr.mxu1 %v2563_v16  ;;  %2494 = vmatprep.subr.mxu0 %v2563_v16 }
 0x21d   :  { %2484 = vmatpush3.msra.mxu1 %v1718_v28  ;;  %2495 = vmatpush3.msra.mxu0 %v1715_v13 }
 0x21e   :  { %2485 = vmatprep.subr.mxu1 %v2563_v16  ;;  %2496 = vmatprep.subr.mxu0 %v2563_v16 }
 0x21f   :  { %2486 = vmatpush3.msra.mxu1 %v1725_v32  ;;  %2497 = vmatpush3.msra.mxu0 %v1722_v6 }
 0x220   :  { %2488 = vmatmul.mubr.f32.vlgmr.msra.gmra.mxu1 %v3058_v48  ;;  %2498 = vmatprep.mubr.msk.f32.mxu0 %vm2564_vm3, %v2563_v16 }
 0x221   :  { %2501 = vmatprep.subr.mxu1 %v2563_v16  ;;  %2512 = vmatprep.subr.mxu0 %v2563_v16 }
 0x222   :  { %2499 = vmatmul.mubr.f32.vlgmr.msra.gmra.mxu0 %v3061_v58  ;;  %2502 = vmatpush3.msra.mxu1 %v3069_v17 }
 0x223   :  { %2513 = vmatpush3.msra.mxu0 %v1702_v12  ;;  %2503 = vmatprep.subr.mxu1 %v2563_v16 }
 0x224   :  { %2514 = vmatprep.subr.mxu0 %v2563_v16  ;;  %2504 = vmatpush3.msra.mxu1 %v3076_v14 }
 0x225   :  { %2515 = vmatpush3.msra.mxu0 %v1709_v26  ;;  %2505 = vmatprep.subr.mxu1 %v2563_v16 }
 0x226   :  { %2516 = vmatprep.subr.mxu0 %v2563_v16  ;;  %2506 = vmatpush3.msra.mxu1 %v3063_v0 }
 0x227   :  { %2517 = vmatpush3.msra.mxu0 %v1716_v15  ;;  %2507 = vmatprep.subr.mxu1 %v2563_v16 }
 0x228   :  { %2518 = vmatprep.subr.mxu0 %v2563_v16  ;;  %2508 = vmatpush3.msra.mxu1 %v3066_v4 }
 0x229   :  { %2509 = vmatprep.mubr.msk.f32.mxu1 %vm2564_vm3, %v2563_v16  ;;  %2519 = vmatpush3.msra.mxu0 %v1723_v7 }
 0x22a   :  { %2510 = vmatmul.mubr.f32.vlgmr.msra.gmra.mxu1 %v1667_v1  ;;  %2523 = vmatprep.subr.mxu1 %v2563_v16 }
 0x22b   :  { %2520 = vmatprep.mubr.msk.f32.mxu0 %vm2564_vm3, %v2563_v16  ;;  %2524 = vmatpush3.msra.mxu1 %v3069_v17 }
 0x22c   :  { %2521 = vmatmul.mubr.f32.vlgmr.msra.gmra.mxu0 %v3058_v48  ;;  %2525 = vmatprep.subr.mxu1 %v2563_v16 }
 0x22d   :  { %2526 = vmatpush3.msra.mxu1 %v3076_v14  ;;  %2531 = vmatprep.mubr.msk.f32.mxu1 %vm2564_vm3, %v2563_v16 }
 0x22e   :  { %2527 = vmatprep.subr.mxu1 %v2563_v16 }
 0x22f   :  { %2528 = vmatpush3.msra.mxu1 %v3063_v0 }
 0x230   :  { %2529 = vmatprep.subr.mxu1 %v2563_v16 }
 0x231   :  { %2530 = vmatpush3.msra.mxu1 %v3066_v4 }
 0x232   :  { %2532 = vmatmul.mubr.f32.vlgmr.msra.gmra.mxu1 %v3058_v48 }
 0x2d8   :  { %v1671_v35 = vpop.f32.mrf.mxu0 }
 0x2d9   :  { %v1672_v36 = vadd.f32 %v1671_v35, %v1591_v22 }
 0x2da   :  { %v2478_v23 = vpop.f32.mrf.mxu0 }
 0x2e0   :  { %v1762_v37 = vpop.f32.mrf.mxu1 }
 0x2e1   :  { %v1763_v46 = vadd.f32 %v1762_v37, %v1672_v36 }
 0x2e2   :  { %v2489_v40 = vpop.f32.mrf.mxu1  ;;  %v1842_v45 = vpop.f32.mrf.mxu0 }
 0x2e3   :  { %v1843_v39 = vadd.f32 %v1842_v45, %v1763_v46 }
 0x2e4   :  { %v2500_v47 = vpop.f32.mrf.mxu0 }
 0x2ea   :  { %v1919_v24 = vpop.f32.mrf.mxu1 }
 0x2eb   :  { %v1920_v49 = vadd.f32 %v1919_v24, %v1843_v39 }
 0x2ec   :  { %v2511_v16 = vpop.f32.mrf.mxu1  ;;  %v2002_v38 = vpop.f32.mrf.mxu0 }
 0x2ed   :  { %v2003_v48 = vadd.f32 %v2002_v38, %v1920_v49 }
 0x2ee   :  { %v2522_v50 = vpop.f32.mrf.mxu0 }
 0x2f2   :  { %v2077_v51 = vpop.f32.mrf.mxu1 }
 0x2f3   :  { %v2078_v42 = vadd.f32 %v2077_v51, %v2003_v48 }
 0x2f4   :  { %v2533_v52 = vpop.f32.mrf.mxu1 }
 0x2f5   :  { %2081 = vst [vmem:[#allocation3] sm:$0x1] %v2078_v42 }
 0x2f6   :  { %2551 = shalt.err (!%p2548_p4)
}
 0x2f7   :  { %2091 = dma.vmem_to_hbm [thread:$0]  %s2089_s23, 16, %s3137_s7, [#allocation4]  }
 0x2f8   :  { %2560 = dma.done.wait [#allocation4], 16  }
 0x2f9   :  { %2561 = vsyncadd [#allocation4], 4294967280 }
 0x2fa   :  { %2095 = vsyncpa [#allocation4], 1 }

</bundles_post_ra>
